<compile_context>
chip_gen: v6e
topology: v6e:2x2x1
jax: 0.10.0
libtpu: 0.0.40
codegen_flags: <defaults>
</compile_context>

<pallas_src>
import jax
import jax.numpy as jnp
from jax.experimental import pallas as pl
from jax.experimental.pallas import tpu as pltpu

_LANE = 128
_SUBLANE = 8


def _pick_tile(n_pixels, n_classes, pred_itemsize,
               per_buffer_budget_bytes=8 * 1024 * 1024):
    """Largest lane-aligned pixel tile whose per-buffer VMEM footprint
    (sublane-padded pred tile + sublane-padded int32 label tile) stays within
    the budget.  Double-buffering doubles it, so 8 MiB/buffer -> ~16 MiB of
    pipelined buffers: safe on v7x (64 MiB physical) and, with the raised
    32 MiB scoped limit, on v5e/v6e as well."""
    c_pad = -(-n_classes // _SUBLANE) * _SUBLANE
    bytes_per_lane = c_pad * pred_itemsize + _SUBLANE * 4  # pred + padded labels
    tn = per_buffer_budget_bytes // bytes_per_lane
    tn = (tn // 512) * 512
    tn = max(tn, _LANE)
    if tn >= n_pixels:
        return n_pixels          # single full-width tile (always a legal block)
    return tn                    # multiple of 128; tail tile masked in-kernel


def _make_cedice_kernel(n_pixels, tn):
    needs_mask = (n_pixels % tn) != 0

    def kernel(pred_ref, lab_ref, out_ref):
        # pred_ref: (C, TN) logits for one (batch, pixel-tile)
        # lab_ref : (1, TN) integer class labels
        # out_ref : (C, 4) partials [intersect, y_sum, z_sum, ce_sum] per pixel tile
        n = pl.program_id(0)     # pixel-tile index (outer, parallel)
        b = pl.program_id(1)     # batch index     (inner, arbitrary/accumulated)

        @pl.when(b == 0)
        def _():
            out_ref[...] = jnp.zeros_like(out_ref)

        p = pred_ref[...].astype(jnp.float32)            # (C, TN)
        lab = lab_ref[...].astype(jnp.int32)             # (1, TN)
        C, TN = p.shape

        if needs_mask:
            lane = jax.lax.broadcasted_iota(jnp.int32, (1, TN), 1)
            valid = (n * TN + lane) < n_pixels           # (1, TN) bool
            valid_f = valid.astype(jnp.float32)
            p = jnp.where(valid, p, 0.0)                 # sanitize tail garbage

        # Numerically stable softmax / log-sum-exp over classes (sublane axis).
        m = jnp.max(p, axis=0, keepdims=True)            # (1, TN)
        e = jnp.exp(p - m)                               # (C, TN)
        se = jnp.sum(e, axis=0, keepdims=True)           # (1, TN)
        inv = pl.reciprocal(se, approx=False)            # exact: keeps 1e-5 tol
        s = e * inv                                      # softmax probs
        lse = m + jnp.log(se)                            # (1, TN)

        # One-hot target.
        cls = jax.lax.broadcasted_iota(jnp.int32, (C, TN), 0)
        y = (lab == cls).astype(jnp.float32)             # (C, TN)

        if needs_mask:
            y = y * valid_f
            s = s * valid_f

        # Cross-entropy partial: sum over pixels of (logsumexp - logit[target]).
        p_at_t = jnp.sum(p * y, axis=0, keepdims=True)   # (1, TN)
        ce_pix = lse - p_at_t
        if needs_mask:
            ce_pix = ce_pix * valid_f
        ce_p = jnp.sum(ce_pix, axis=1, keepdims=True)    # (1, 1)

        # Dice partials (per class): one lane reduction each.
        inter_p = jnp.sum(s * y, axis=1, keepdims=True)  # (C, 1)
        ysum_p = jnp.sum(y, axis=1, keepdims=True)       # (C, 1)   (y*y == y)
        zsum_p = jnp.sum(s * s, axis=1, keepdims=True)   # (C, 1)
        ce_col = jnp.broadcast_to(ce_p, (C, 1))          # duplicated; row 0 read back

        # Pack the four (C, 1) columns into one (C, 4) update with VPU selects.
        lane4 = jax.lax.broadcasted_iota(jnp.int32, (C, 4), 1)
        upd = (jnp.where(lane4 == 0, inter_p, 0.0)
               + jnp.where(lane4 == 1, ysum_p, 0.0)
               + jnp.where(lane4 == 2, zsum_p, 0.0)
               + jnp.where(lane4 == 3, ce_col, 0.0))     # (C, 4)

        out_ref[...] += upd

    return kernel


def ce_dice_loss(pred, target, loss_weight=(0.4, 0.6), tile_lanes=None):
    """JAX/Pallas equivalent of CeDiceLoss(num_classes, loss_weight)(pred, target)."""
    B, C = int(pred.shape[0]), int(pred.shape[1])
    N = 1
    for d in pred.shape[2:]:
        N *= int(d)

    logits = pred.reshape(B, C, N)                       # free view, native dtype
    labels = target.reshape(B, 1, N)
    if not jnp.issubdtype(labels.dtype, jnp.integer):
        labels = labels.astype(jnp.int32)                # matches target[:].long()

    pred_isz = jnp.dtype(pred.dtype).itemsize
    lab_isz = jnp.dtype(labels.dtype).itemsize
    tn = tile_lanes if tile_lanes is not None else _pick_tile(N, C, pred_isz)
    kn = -(-N // tn)                                     # ceil-div pixel-tile count
    grid = (kn, B)

    cost = pl.CostEstimate(
        flops=B * N * (6 * C + 8),
        transcendentals=B * N * (C + 2),
        bytes_accessed=B * N * (C * pred_isz + lab_isz) + kn * C * 4 * 4,
    )

    parts = pl.pallas_call(
        _make_cedice_kernel(N, tn),
        out_shape=jax.ShapeDtypeStruct((kn, C, 4), jnp.float32),
        grid_spec=pltpu.PrefetchScalarGridSpec(
            num_scalar_prefetch=0,
            grid=grid,
            in_specs=[
                pl.BlockSpec((None, C, tn), lambda n, b: (b, 0, n)),
                pl.BlockSpec((None, 1, tn), lambda n, b: (b, 0, n)),
            ],
            out_specs=pl.BlockSpec((None, C, 4), lambda n, b: (n, 0, 0)),
        ),
        compiler_params=pltpu.CompilerParams(
            dimension_semantics=("parallel", "arbitrary"),
            vmem_limit_bytes=32 * 1024 * 1024,
        ),
        cost_estimate=cost,
    )(logits, labels)

    # Tiny finalization on the (kn, C, 4) partials.
    inter = jnp.sum(parts[:, :, 0], axis=0)              # (C,)
    ysum = jnp.sum(parts[:, :, 1], axis=0)                # (C,)
    zsum = jnp.sum(parts[:, :, 2], axis=0)                # (C,)
    ce_sum = jnp.sum(parts[:, 0, 3])                      # scalar

    smooth = 1e-5
    dice = 1.0 - (2.0 * inter + smooth) / (zsum + ysum + smooth)
    loss_dice = jnp.sum(dice) / C
    loss_ce = ce_sum / (B * N)
    return loss_weight[0] * loss_ce + loss_weight[1] * loss_dice


def _reference(pred, target, loss_weight=(0.4, 0.6)):
    """Pure-JAX oracle matching CeDiceLoss semantics."""
    B, C = pred.shape[0], pred.shape[1]
    logits = pred.astype(jnp.float32).reshape(B, C, -1)   # (B, C, N)
    labels = target.astype(jnp.int32).reshape(B, -1)      # (B, N)

    # nn.CrossEntropyLoss (mean over all pixels)
    logp = jax.nn.log_softmax(logits, axis=1)
    ce = -jnp.mean(jnp.take_along_axis(logp, labels[:, None, :], axis=1))

    # nDiceLoss with softmax=True, equal class weights, sums over the whole batch
    probs = jax.nn.softmax(logits, axis=1)
    onehot = (labels[:, None, :] == jnp.arange(C)[None, :, None]).astype(jnp.float32)
    smooth = 1e-5
    inter = jnp.sum(probs * onehot, axis=(0, 2))
    zsum = jnp.sum(probs * probs, axis=(0, 2))
    ysum = jnp.sum(onehot, axis=(0, 2))
    dice = 1.0 - (2.0 * inter + smooth) / (zsum + ysum + smooth)
    loss_dice = jnp.sum(dice) / C
    return loss_weight[0] * ce + loss_weight[1] * loss_dice


if __name__ == "__main__":
    key = jax.random.PRNGKey(0)
    k1, k2, k3, k4 = jax.random.split(key, 4)

    # Primary check at module-consistent small shapes.
    B, C, H, W = 2, 4, 16, 16
    pred = jax.random.normal(k1, (B, C, H, W), jnp.float32)       # raw logits
    target = jax.random.randint(k2, (B, H, W), 0, C, jnp.int32)   # class labels
    loss = jax.block_until_ready(ce_dice_loss(pred, target))
    ref = jax.block_until_ready(_reference(pred, target))
    assert jnp.allclose(loss, ref, rtol=1e-5, atol=1e-5), (loss, ref)

    # Secondary check: multi-tile accumulation + masked tail tile (N=240 with a
    # forced 128-lane tile) and a class count that is not a multiple of 8.
    B2, C2, H2, W2 = 1, 5, 12, 20
    pred2 = jax.random.normal(k3, (B2, C2, H2, W2), jnp.float32)
    target2 = jax.random.randint(k4, (B2, H2, W2), 0, C2, jnp.int32)
    loss2 = jax.block_until_ready(ce_dice_loss(pred2, target2, tile_lanes=128))
    ref2 = jax.block_until_ready(_reference(pred2, target2))
    assert jnp.allclose(loss2, ref2, rtol=1e-5, atol=1e-5), (loss2, ref2)

    print("KERNEL_OK")
</pallas_src>

<mosaic_0001>
module attributes {stable_mosaic.version = 11 : i64} {
  func.func @kernel(%arg0: i32, %arg1: i32, %arg2: memref<1x4x256xf32, #tpu.memory_space<vmem>>, %arg3: memref<1x1x256xi32, #tpu.memory_space<vmem>>, %arg4: memref<1x4x4xf32, #tpu.memory_space<vmem>>) attributes {dimension_semantics = [#tpu.dimension_semantics<parallel>, #tpu.dimension_semantics<arbitrary>], iteration_bounds = array<i64: 1, 2>, scalar_prefetch = 0 : i64, scratch_operands = 0 : i64, tpu.core_type = #tpu.core_type<tc>, window_params = [{transform_indices = @transform_0, window_bounds = array<i64: 1, 4, 256>}, {transform_indices = @transform_1, window_bounds = array<i64: 1, 1, 256>}, {transform_indices = @transform_2, window_bounds = array<i64: 1, 4, 4>}]} {
    %c0_i32 = arith.constant 0 : i32
    %0 = arith.cmpi eq, %arg1, %c0_i32 : i32
    %1 = arith.extui %0 : i1 to i32
    %c0_i32_0 = arith.constant 0 : i32
    %2 = arith.cmpi ne, %1, %c0_i32_0 : i32
    scf.if %2 {
      %cst_23 = arith.constant 0.000000e+00 : f32
      %74 = vector.broadcast %cst_23 : f32 to vector<4x4xf32>
      %c0_24 = arith.constant 0 : index
      %c0_25 = arith.constant 0 : index
      %c0_26 = arith.constant 0 : index
      %75 = vector.load %arg4[%c0_24, %c0_25, %c0_26] : memref<1x4x4xf32, #tpu.memory_space<vmem>>, vector<1x4x4xf32>
      %76 = vector.shape_cast %75 : vector<1x4x4xf32> to vector<4x4xf32>
      %77 = vector.shape_cast %74 : vector<4x4xf32> to vector<1x4x4xf32>
      tpu.vector_store %arg4[%c0_24, %c0_25, %c0_26], %77 {strides = array<i32>} : memref<1x4x4xf32, #tpu.memory_space<vmem>>, vector<1x4x4xf32>,
    } else {
    }
    %c0 = arith.constant 0 : index
    %c0_1 = arith.constant 0 : index
    %c0_2 = arith.constant 0 : index
    %3 = vector.load %arg2[%c0, %c0_1, %c0_2] : memref<1x4x256xf32, #tpu.memory_space<vmem>>, vector<1x4x256xf32>
    %4 = vector.shape_cast %3 : vector<1x4x256xf32> to vector<4x256xf32>
    %c0_3 = arith.constant 0 : index
    %c0_4 = arith.constant 0 : index
    %c0_5 = arith.constant 0 : index
    %5 = vector.load %arg3[%c0_3, %c0_4, %c0_5] : memref<1x1x256xi32, #tpu.memory_space<vmem>>, vector<1x1x256xi32>
    %6 = vector.shape_cast %5 : vector<1x1x256xi32> to vector<1x256xi32>
    %cst = arith.constant dense<0xFF800000> : vector<256xf32>
    %7 = vector.multi_reduction <maximumf>, %4, %cst [0] : vector<4x256xf32> to vector<256xf32>
    %8 = vector.shape_cast %7 : vector<256xf32> to vector<1x256xf32>
    %9 = vector.broadcast %8 : vector<1x256xf32> to vector<4x256xf32>
    %10 = arith.subf %4, %9 : vector<4x256xf32>
    %11 = math.exp %10 : vector<4x256xf32>
    %cst_6 = arith.constant dense<0.000000e+00> : vector<256xf32>
    %12 = vector.multi_reduction <add>, %11, %cst_6 [0] : vector<4x256xf32> to vector<256xf32>
    %13 = vector.shape_cast %12 : vector<256xf32> to vector<1x256xf32>
    %14 = tpu.reciprocal %13 : vector<1x256xf32> -> vector<1x256xf32>
    %15 = vector.broadcast %14 : vector<1x256xf32> to vector<4x256xf32>
    %16 = arith.mulf %11, %15 : vector<4x256xf32>
    %17 = math.log %13 : vector<1x256xf32>
    %18 = arith.addf %8, %17 : vector<1x256xf32>
    %19 = tpu.iota {dimensions = array<i32: 0>} : vector<4x256xi32>
    %20 = vector.broadcast %6 : vector<1x256xi32> to vector<4x256xi32>
    %21 = arith.cmpi eq, %20, %19 : vector<4x256xi32>
    %22 = arith.extui %21 : vector<4x256xi1> to vector<4x256xi32>
    %23 = arith.sitofp %22 : vector<4x256xi32> to vector<4x256xf32>
    %24 = arith.mulf %4, %23 : vector<4x256xf32>
    %cst_7 = arith.constant dense<0.000000e+00> : vector<256xf32>
    %25 = vector.multi_reduction <add>, %24, %cst_7 [0] : vector<4x256xf32> to vector<256xf32>
    %26 = vector.shape_cast %25 : vector<256xf32> to vector<1x256xf32>
    %27 = arith.subf %18, %26 : vector<1x256xf32>
    %cst_8 = arith.constant dense<0.000000e+00> : vector<1xf32>
    %28 = vector.multi_reduction <add>, %27, %cst_8 [1] : vector<1x256xf32> to vector<1xf32>
    %29 = vector.shape_cast %28 : vector<1xf32> to vector<1x1xf32>
    %30 = arith.mulf %16, %23 : vector<4x256xf32>
    %cst_9 = arith.constant dense<0.000000e+00> : vector<4xf32>
    %31 = vector.multi_reduction <add>, %30, %cst_9 [1] : vector<4x256xf32> to vector<4xf32>
    %32 = vector.shape_cast %31 : vector<4xf32> to vector<4x1xf32>
    %cst_10 = arith.constant dense<0.000000e+00> : vector<4xf32>
    %33 = vector.multi_reduction <add>, %23, %cst_10 [1] : vector<4x256xf32> to vector<4xf32>
    %34 = vector.shape_cast %33 : vector<4xf32> to vector<4x1xf32>
    %35 = arith.mulf %16, %16 : vector<4x256xf32>
    %cst_11 = arith.constant dense<0.000000e+00> : vector<4xf32>
    %36 = vector.multi_reduction <add>, %35, %cst_11 [1] : vector<4x256xf32> to vector<4xf32>
    %37 = vector.shape_cast %36 : vector<4xf32> to vector<4x1xf32>
    %38 = vector.shape_cast %29 : vector<1x1xf32> to vector<1x1xf32>
    %39 = vector.broadcast %38 : vector<1x1xf32> to vector<4x1xf32>
    %40 = tpu.iota {dimensions = array<i32: 1>} : vector<4x4xi32>
    %c0_i32_12 = arith.constant 0 : i32
    %41 = vector.broadcast %c0_i32_12 : i32 to vector<4x4xi32>
    %42 = arith.cmpi eq, %40, %41 : vector<4x4xi32>
    %cst_13 = arith.constant 0.000000e+00 : f32
    %43 = vector.shape_cast %32 : vector<4x1xf32> to vector<4x1xf32>
    %44 = vector.broadcast %43 : vector<4x1xf32> to vector<4x4xf32>
    %45 = vector.broadcast %cst_13 : f32 to vector<4x4xf32>
    %46 = arith.select %42, %44, %45 : vector<4x4xi1>, vector<4x4xf32>
    %c1_i32 = arith.constant 1 : i32
    %47 = vector.broadcast %c1_i32 : i32 to vector<4x4xi32>
    %48 = arith.cmpi eq, %40, %47 : vector<4x4xi32>
    %cst_14 = arith.constant 0.000000e+00 : f32
    %49 = vector.shape_cast %34 : vector<4x1xf32> to vector<4x1xf32>
    %50 = vector.broadcast %49 : vector<4x1xf32> to vector<4x4xf32>
    %51 = vector.broadcast %cst_14 : f32 to vector<4x4xf32>
    %52 = arith.select %48, %50, %51 : vector<4x4xi1>, vector<4x4xf32>
    %53 = arith.addf %46, %52 : vector<4x4xf32>
    %c2_i32 = arith.constant 2 : i32
    %54 = vector.broadcast %c2_i32 : i32 to vector<4x4xi32>
    %55 = arith.cmpi eq, %40, %54 : vector<4x4xi32>
    %cst_15 = arith.constant 0.000000e+00 : f32
    %56 = vector.shape_cast %37 : vector<4x1xf32> to vector<4x1xf32>
    %57 = vector.broadcast %56 : vector<4x1xf32> to vector<4x4xf32>
    %58 = vector.broadcast %cst_15 : f32 to vector<4x4xf32>
    %59 = arith.select %55, %57, %58 : vector<4x4xi1>, vector<4x4xf32>
    %60 = arith.addf %53, %59 : vector<4x4xf32>
    %c3_i32 = arith.constant 3 : i32
    %61 = vector.broadcast %c3_i32 : i32 to vector<4x4xi32>
    %62 = arith.cmpi eq, %40, %61 : vector<4x4xi32>
    %cst_16 = arith.constant 0.000000e+00 : f32
    %63 = vector.shape_cast %39 : vector<4x1xf32> to vector<4x1xf32>
    %64 = vector.broadcast %63 : vector<4x1xf32> to vector<4x4xf32>
    %65 = vector.broadcast %cst_16 : f32 to vector<4x4xf32>
    %66 = arith.select %62, %64, %65 : vector<4x4xi1>, vector<4x4xf32>
    %67 = arith.addf %60, %66 : vector<4x4xf32>
    %c0_17 = arith.constant 0 : index
    %c0_18 = arith.constant 0 : index
    %c0_19 = arith.constant 0 : index
    %68 = vector.load %arg4[%c0_17, %c0_18, %c0_19] : memref<1x4x4xf32, #tpu.memory_space<vmem>>, vector<1x4x4xf32>
    %69 = vector.shape_cast %68 : vector<1x4x4xf32> to vector<4x4xf32>
    %70 = arith.addf %69, %67 : vector<4x4xf32>
    %c0_20 = arith.constant 0 : index
    %c0_21 = arith.constant 0 : index
    %c0_22 = arith.constant 0 : index
    %71 = vector.load %arg4[%c0_20, %c0_21, %c0_22] : memref<1x4x4xf32, #tpu.memory_space<vmem>>, vector<1x4x4xf32>
    %72 = vector.shape_cast %71 : vector<1x4x4xf32> to vector<4x4xf32>
    %73 = vector.shape_cast %70 : vector<4x4xf32> to vector<1x4x4xf32>
    tpu.vector_store %arg4[%c0_20, %c0_21, %c0_22], %73 {strides = array<i32>} : memref<1x4x4xf32, #tpu.memory_space<vmem>>, vector<1x4x4xf32>,
    return
  }
  func.func @transform_0(%arg0: i32, %arg1: i32) -> (i32, i32, i32) {
    %c0_i32 = arith.constant 0 : i32
    %c0_i32_0 = arith.constant 0 : i32
    return %arg1, %c0_i32, %arg0 : i32, i32, i32
  }
  func.func @transform_1(%arg0: i32, %arg1: i32) -> (i32, i32, i32) {
    %c0_i32 = arith.constant 0 : i32
    %c0_i32_0 = arith.constant 0 : i32
    return %arg1, %c0_i32, %arg0 : i32, i32, i32
  }
  func.func @transform_2(%arg0: i32, %arg1: i32) -> (i32, i32, i32) {
    %c0_i32 = arith.constant 0 : i32
    %c0_i32_0 = arith.constant 0 : i32
    %c0_i32_1 = arith.constant 0 : i32
    return %arg0, %c0_i32, %c0_i32_0 : i32, i32, i32
  }
}

</mosaic_0001>

<bundles_post_ra>
// kernel: tpu_custom_call.1
= control target key start
LH: loop header
LB: loop body
LE: loop exit
PB: predicated region body
PF: predicated region fallthrough
CT: control target
= control target key end

     0   :  { %7 = vsyncpa [#allocation3], 0  ;;  %s879_s0 = inlined_call_operand.hbm [shape: f32[2,4,256], index: 0, kind: input, shape index: {}]   ;;  %s880_s1 = inlined_call_operand.hbm [shape: s32[2,1,256], index: 1, kind: input, shape index: {}]   ;;  %s881_s2 = inlined_call_operand.hbm [shape: f32[1,4,4], index: 2, kind: output, shape index: {}]  }
   0x1   :  { %9 = vsyncpa [#allocation3 + $0x1], 0 }
   0x2   :  { %10 = vsyncpa [#allocation6], 0 }
   0x3   :  { %12 = vsyncpa [#allocation6 + $0x1], 0 }
   0x4   :  { %13 = vsyncpa [#allocation4], 0  ;;  %s719_s9 = smov 0   ;;  %s721_s10 = smov 0  }
   0x5   :  { %s723_s11 = smov 0   ;;  %s725_s12 = smov 0  }
   0x6   :  { %s727_s13 = smov 0   ;;  %s729_s14 = smov 0  }
   0x7 LB: > { %s458_s15 = sadd.s32 4294967295, %s697_s14   ;;  %s28_s16 = sadd.s32 1, %s693_s13  ;;  %s697_s14 = sphi %s729_s14, %s19_s14   ;;  %s693_s13 = sphi %s727_s13, %s891_s13   ;;  %s689_s12 = sphi %s725_s12, %s890_s12   ;;  %s685_s11 = sphi %s723_s11, %s889_s11   ;;  %s681_s10 = sphi %s721_s10, %s888_s10   ;;  %s677_s9 = sphi %s719_s9, %s887_s9  }
   0x8   : > { %p29_p0 = scmp.ge.s32.totalorder %s28_s16, 2  ;;  %s40_s17 = sadd.s32 1, %s685_s11 }
   0x9   : > { %p47_p1 = scmp.ne.s32.totalorder %s685_s11, %s681_s10  ;;  %p48_p2 = scmp.eq.s32.totalorder %s697_s14, 0 }
   0xa   : > { %s893_s16 = smov (%p29_p0, %s28_s16), 0  ;;  %p53_p4 = scmp.ne.s32.totalorder %s681_s10, %s677_s9 }
   0xb   : > { %p755_p3 = por %p48_p2, %p47_p1  ;;  %s35_s19 = ssub.s32 %s693_s13, %s893_s16 }
   0xc   : > { %p54_p5 = scmp.eq.s32.totalorder %s458_s15, 0  ;;  %p38_p6 = scmp.eq.s32.totalorder %s35_s19, 0 }
   0xd   : > { %p494_p8 = scmp.lt.s32.totalorder %s697_s14, 2  ;;  %s773_s22 = sand.u32 1, %s685_s11  }
   0xe   : > { %p764_p7 = por %p54_p5, %p53_p4  ;;  %s477_s23 = sshll.u32 %s693_s13, 7 }
   0xf   : > { %s770_s21 = scalar_select %p38_p6, %s685_s11, %s40_s17  }
  0x10   : > { %s461_s24 = sshll.u32 %s773_s22, 3  ;;  %s143_s27 = scalar_lea.hbm %s879_s0, %s477_s23 }
  0x11   : > { %s135_s28 = scalar_lea.vmem [#allocation2], %s461_s24  ;;  %p782_p9 = pnand %p494_p8, %p755_p3 }
  0x12   : > { %s145_s29 = sshll.u32 %s135_s28, 4  ;;  %p467_p10 = scmp.ge.s32.totalorder %s697_s14, 1  ;;  %s146_s29 = int_to_ptr.vmem [resolvable:$true] %s145_s29 }
  0x13   : > { %p171_p11 = scmp.lt.s32.totalorder %s697_s14, 3  ;;  %s132_s3 = scalar_lea.sflag [#allocation3], %s773_s22 }
  0x14   : > { %p561_p12 = pneg %p782_p9  ;;  %s572_s4 = scalar_lea.vmem %s146_s29, 128 }
  0x15   : > { %p573_p13 = scmp.ne.s32.totalorder %s146_s29, %s572_s4  ;;  %s699_s5 = smov [#allocation2]  }
  0x16   : > { %s577_s6 = sshll.u32 %s699_s5, 4  ;;  %s578_s6 = int_to_ptr.vmem [resolvable:$false] %s577_s6 }
  0x17   : > { %p575_p0 = pnand %p573_p13, %p561_p12  ;;  %s579_s7 = scalar_lea.vmem %s578_s6, 256 }
  0x18   : > { %p580_p2 = scmp.lt.s32.totalorder %s146_s29, %s578_s6  ;;  %p581_p3 = scmp.lt.s32.totalorder %s579_s7, %s572_s4 }
  0x19   : > { %p576_p1 = pneg %p575_p0 }
  0x1a   : > { %p582_p4 = por %p581_p3, %p580_p2 }
  0x1c   : > { %p583_p5 = pnand %p582_p4, %p576_p1 }
  0x1e   : > { %586 = shalt.err (!%p583_p5)
}
  0x1f   : > { %490 = dma.hbm_to_vmem [thread:$0]  (!%p782_p9), %s143_s27, 128, %s146_s29, %s132_s3  }
  0x20   : > { %p800_p6 = pnand %p467_p10, %p171_p11  ;;  %s464_s9 = sshll.u32 %s773_s22, 1 }
  0x21   : > { %s478_s17 = sshll.u32 %s693_s13, 5  ;;  %s156_s24 = scalar_lea.vmem [#allocation5], %s464_s9 }
  0x22   : > { %s164_s23 = scalar_lea.hbm %s880_s1, %s478_s17  ;;  %s166_s25 = sshll.u32 %s156_s24, 4  ;;  %s167_s25 = int_to_ptr.vmem [resolvable:$true] %s166_s25 }
  0x23   : > { %s153_s26 = scalar_lea.sflag [#allocation6], %s773_s22  ;;  %s600_s28 = scalar_lea.vmem %s167_s25, 32 }
  0x24   : > { %p601_p8 = scmp.ne.s32.totalorder %s167_s25, %s600_s28  ;;  %s700_s27 = smov [#allocation5]  }
  0x25   : > { %s605_s29 = sshll.u32 %s700_s27, 4  ;;  %s606_s29 = int_to_ptr.vmem [resolvable:$false] %s605_s29 }
  0x26   : > { %p603_p13 = pnand %p601_p8, %p561_p12  ;;  %s607_s3 = scalar_lea.vmem %s606_s29, 64 }
  0x27   : > { %p608_p10 = scmp.lt.s32.totalorder %s167_s25, %s606_s29  ;;  %p609_p11 = scmp.lt.s32.totalorder %s607_s3, %s600_s28 }
  0x28   : > { %p604_p0 = pneg %p603_p13 }
  0x29   : > { %p610_p1 = por %p609_p11, %p608_p10 }
  0x2b   : > { %p611_p2 = pnand %p610_p1, %p604_p0 }
  0x2d   : > { %614 = shalt.err (!%p611_p2)
}
  0x2e   : > { %493 = dma.hbm_to_vmem [thread:$0]  (!%p782_p9), %s164_s23, 32, %s167_s25, %s153_s26  }
  0x2f   : > { %175 = sbr.rel (%p800_p6) target bundleno = 297 (0x129), region = 28  ;;  %s177_s22 = sand.u32 (!%p800_p6), 1, %s681_s10  }
  0x30   : > { %s468_s4 = sshll.u32 (!%p800_p6), %s177_s22, 3  ;;  %s178_s5 = scalar_lea.sflag (!%p800_p6), [#allocation3], %s177_s22 }
  0x31   : > { %s181_s6 = scalar_lea.vmem (!%p800_p6), [#allocation2], %s468_s4 }
  0x34   : > { %664 = dma.done.wait (%p764_p7), %s178_s5, 128  }
  0x35   : > { %666 = vsyncadd (%p764_p7), %s178_s5, 4294967168  ;;  %s469_s7 = sshll.u32 %s177_s22, 1  ;;  %s187_s9 = scalar_lea.sflag [#allocation6], %s177_s22 }
  0x36   : > { %s822_s17 = scalar_lea.vmem [#allocation5], %s469_s7 }
  0x37   : > { %668 = dma.done.wait (%p764_p7), %s187_s9, 32  }
  0x38   : > { %670 = vsyncadd (%p764_p7), %s187_s9, 4294967264  ;;  %p470_p9 = scmp.ne.s32.totalorder %s689_s12, 0 }
  0x3a   : > { %216 = sbr.rel (%p470_p9) target bundleno = 65 (0x41), region = 40 }
  0x3f   : > { %vm217_vm0 = vcmask 27648   ;;  %v701_v0 = vmov 0.0  }
  0x40   : > { %218 = vst.msk [vmem:[#allocation7] sm:$0xf] %vm217_vm0, %v701_v0 }
  0x41 PF: > { %v219_v1 = vld [vmem:[%s181_s6] sm:$0xff]  ;;  %vm224_vm1 = vcmask 1043456   ;;  %v276_v14 = vlaneseq  ;;  %v220_v23 = vld [vmem:[%s822_s17] sm:$0x3]  ;;  %v702_v27 = vmov 0.0   ;;  %s703_s12 = smov [#allocation7]  }
  0x42   : > { %v222_v2 = vcombine.high %v219_v1, %v219_v1  ;;  %v225_v3 = vsel %vm224_vm1, %v219_v1, -inf  ;;  %s368_s20 = sshll.u32 %s703_s12, 4  ;;  %vm357_vm8 = vcmask 27648   ;;  %p846_p7 = scmp.eq.s32.totalorder %s458_s15, 1  ;;  %s369_s20 = int_to_ptr.vmem [resolvable:$true] %s368_s20 }
  0x43   : > { %v226_v4 = vrot.slane %v225_v3, 4  ;;  %v277_v18 = vshrl.u32 %v276_v14, 7  ;;  %s615_s8 = scalar_lea.vmem %s369_s20, 64  ;;  %p622_p5 = scmp.lt.s32.totalorder %s369_s20, %s369_s20 }
  0x44   : > { %v232_v5 = vsel %vm224_vm1, %v222_v2, -inf  ;;  %p616_p12 = scmp.ne.s32.totalorder %s369_s20, %s615_s8  ;;  %p623_p6 = scmp.lt.s32.totalorder %s615_s8, %s615_s8 }
  0x45   : > { %v227_v6 = vmax.f32 %v225_v3, %v226_v4  ;;  %v233_v7 = vrot.slane %v232_v5, 4  ;;  %v280_v21 = vsub.s32 0, %v277_v18  ;;  %v284_v22 = vsub.s32 1, %v277_v18 }
  0x46   : > { %p617_p3 = pnand %p616_p12, %p846_p7  ;;  %p624_p8 = por %p623_p6, %p622_p5 }
  0x47   : > { %v228_v8 = vrot.slane %v227_v6, 2  ;;  %v234_v9 = vmax.f32 %v232_v5, %v233_v7  ;;  %v281_v25 = vrot.slane %v220_v23, %v280_v21  ;;  %v285_v26 = vrot.slane %v220_v23, %v284_v22 }
  0x48   : > { %p618_p4 = pneg %p617_p3 }
  0x49   : > { %v229_v10 = vmax.f32 %v227_v6, %v228_v8  ;;  %v235_v11 = vrot.slane %v234_v9, 2  ;;  %vm286_vm2 = vcmp.eq.s32.totalorder %v281_v25, %v277_v18  ;;  %vm287_vm3 = vcmp.eq.s32.totalorder %v285_v26, %v277_v18 }
  0x4a   : > { %v471_v28 = vsel %vm286_vm2, 1.0, %v702_v27  ;;  %v472_v29 = vsel %vm287_vm3, 1.0, %v702_v27  ;;  %v343_v26 = vand.u32 127, %v276_v14  ;;  %p625_p13 = pnand %p624_p8, %p618_p4 }
  0x4b   : > { %v230_v12 = vrot.slane %v229_v10, 1  ;;  %v236_v13 = vmax.f32 %v234_v9, %v235_v11  ;;  %v294_v30 = vcombine.low %v471_v28, %v472_v29  ;;  %v328_v22 = vsel %vm224_vm1, %v471_v28, 0.0 }
  0x4c   : > { %vm344_vm4 = vcmp.eq.s32.totalorder %v343_v26, 0  ;;  %vm346_vm5 = vcmp.eq.s32.totalorder %v343_v26, 1  ;;  %vm349_vm6 = vcmp.eq.s32.totalorder %v343_v26, 2  ;;  %vm352_vm7 = vcmp.eq.s32.totalorder %v343_v26, 3 }
  0x4d   : > { %v231_v15 = vmax.f32 %v229_v10, %v230_v12  ;;  %v237_v16 = vrot.slane %v236_v13, 1  ;;  %v296_v35 = vmul.f32 %v294_v30, %v219_v1 }
  0x4f   : > { %v238_v17 = vmax.f32 %v236_v13, %v237_v16  ;;  %v298_v41 = vcombine.high %v296_v35, %v296_v35  ;;  %v300_v46 = vsel %vm224_vm1, %v296_v35, 0.0 }
  0x50   : > { %v301_v50 = vrot.slane %v300_v46, 4 }
  0x51   : > { %v241_v19 = vcombine.low %v231_v15, %v238_v17  ;;  %v307_v47 = vsel %vm224_vm1, %v298_v41, 0.0 }
  0x52   : > { %v308_v51 = vrot.slane %v307_v47, 4  ;;  %v302_v53 = vadd.f32 %v301_v50, %v300_v46 }
  0x53   : > { %v243_v20 = vsub.f32 %v219_v1, %v241_v19 }
  0x54   : > { %v309_v54 = vadd.f32 %v308_v51, %v307_v47  ;;  %v303_v55 = vrot.slane %v302_v53, 2 }
  0x55   : > { %v244_v24 = vmul.f32 1.442695, %v243_v20 }
  0x56   : > { %v310_v56 = vrot.slane %v309_v54, 2  ;;  %v304_v57 = vadd.f32 %v303_v55, %v302_v53 }
  0x57   : > { %549 = vpow2.f32 %v244_v24 }
  0x58   : > { %v311_v58 = vadd.f32 %v310_v56, %v309_v54  ;;  %v305_v63 = vrot.slane %v304_v57, 1 }
  0x5a   : > { %v312_v0 = vrot.slane %v311_v58, 1  ;;  %v306_v7 = vadd.f32 %v305_v63, %v304_v57 }
  0x5c   : > { %v313_v8 = vadd.f32 %v312_v0, %v311_v58 }
  0x64   : > { %v550_v31 = vpop.eup %549 }
  0x65   : > { %v247_v32 = vcombine.high %v550_v31, %v550_v31  ;;  %v249_v33 = vsel %vm224_vm1, %v550_v31, 0.0 }
  0x66   : > { %v250_v34 = vrot.slane %v249_v33, 4 }
  0x67   : > { %v256_v36 = vsel %vm224_vm1, %v247_v32, 0.0 }
  0x68   : > { %v251_v37 = vadd.f32 %v250_v34, %v249_v33  ;;  %v257_v38 = vrot.slane %v256_v36, 4 }
  0x6a   : > { %v252_v39 = vrot.slane %v251_v37, 2  ;;  %v258_v40 = vadd.f32 %v257_v38, %v256_v36 }
  0x6c   : > { %v253_v42 = vadd.f32 %v252_v39, %v251_v37  ;;  %v259_v43 = vrot.slane %v258_v40, 2  ;;  %v355_v37 = vld [vmem:[#allocation7] sm:$0xf] }
  0x6e   : > { %v254_v44 = vrot.slane %v253_v42, 1  ;;  %v260_v45 = vadd.f32 %v259_v43, %v258_v40 }
  0x70   : > { %v255_v48 = vadd.f32 %v254_v44, %v253_v42  ;;  %v261_v49 = vrot.slane %v260_v45, 1 }
  0x72   : > { %v262_v52 = vadd.f32 %v261_v49, %v260_v45  ;;  %551 = vrcp.f32 %v255_v48 }
  0x73   : > { %553 = vlog2.f32 %v255_v48 }
  0x74   : > { %555 = vrcp.f32 %v262_v52 }
  0x75   : > { %557 = vlog2.f32 %v262_v52 }
  0x7f   : > { %v552_v59 = vpop.eup %551 }
  0x80   : > { %v554_v60 = vpop.eup %553 }
  0x81   : > { %v556_v61 = vpop.eup %555  ;;  %v271_v62 = vmul.f32 0.6931472, %v554_v60 }
  0x82   : > { %v558_v1 = vpop.eup %557  ;;  %v267_v2 = vcombine.low %v552_v59, %v556_v61 }
  0x83   : > { %v273_v3 = vmul.f32 0.6931472, %v558_v1  ;;  %v274_v5 = vadd.f32 %v271_v62, %v231_v15  ;;  %v329_v15 = vsel %vm224_vm1, %v472_v29, 0.0 }
  0x84   : > { %v269_v4 = vmul.f32 %v550_v31, %v267_v2  ;;  %v330_v24 = vadd.f32 %v329_v15, %v328_v22 }
  0x85   : > { %v275_v6 = vadd.f32 %v273_v3, %v238_v17  ;;  %v314_v18 = vsub.f32 %v274_v5, %v306_v7 }
  0x86   : > { %v319_v9 = vmul.f32 %v294_v30, %v269_v4  ;;  %v333_v10 = vmul.f32 %v269_v4, %v269_v4 }
  0x87   : > { %v315_v19 = vsub.f32 %v275_v6, %v313_v8 }
  0x88   : > { %v321_v11 = vcombine.high %v319_v9, %v319_v9  ;;  %v323_v12 = vsel %vm224_vm1, %v319_v9, 0.0  ;;  %v335_v13 = vcombine.high %v333_v10, %v333_v10  ;;  %v337_v16 = vsel %vm224_vm1, %v333_v10, 0.0 }
  0x89   : > { %v316_v25 = vadd.f32 %v315_v19, %v314_v18 }
  0x8a   : > { %v324_v20 = vsel %vm224_vm1, %v321_v11, 0.0  ;;  %v338_v21 = vsel %vm224_vm1, %v335_v13, 0.0 }
  0x8b   : > { %v325_v17 = vadd.f32 %v324_v20, %v323_v12  ;;  %v339_v23 = vadd.f32 %v338_v21, %v337_v16 }
  0x8d   : > { %326 = vadd.xlane.f32.xlu0 %v325_v17  ;;  %340 = vadd.xlane.f32.xlu1 %v339_v23 }
  0x91   : > { %331 = vadd.xlane.f32.xlu0 %v330_v24  ;;  %317 = vadd.xlane.f32.xlu1 %v316_v25 }
 0x116   : > { %v327_v27 = vpop.xlane.xlu0 %326  ;;  %v341_v30 = vpop.xlane.xlu1 %340 }
 0x117   : > { %v345_v29 = vsel %vm344_vm4, %v327_v27, 0.0  ;;  %v350_v34 = vsel %vm349_vm6, %v341_v30, 0.0 }
 0x11a   : > { %v332_v31 = vpop.xlane.xlu0 %331  ;;  %v318_v28 = vpop.xlane.xlu1 %317 }
 0x11b   : > { %v347_v32 = vsel %vm346_vm5, %v332_v31, 0.0  ;;  %v353_v35 = vsel %vm352_vm7, %v318_v28, 0.0 }
 0x11c   : > { %v348_v33 = vadd.f32 %v347_v32, %v345_v29 }
 0x11e   : > { %v351_v36 = vadd.f32 %v350_v34, %v348_v33 }
 0x120   : > { %v354_v38 = vadd.f32 %v353_v35, %v351_v36 }
 0x122   : > { %v356_v14 = vadd.f32 %v355_v37, %v354_v38 }
 0x124   : > { %358 = vst.msk [vmem:[#allocation7] sm:$0xf] %vm357_vm8, %v356_v14 }
 0x125   : > { %628 = shalt.err (!%p625_p13)
}
 0x126   : > { %484 = dma.vmem_to_hbm [thread:$0]  (%p846_p7), %s369_s20, 64, %s881_s2, [#allocation4]  }
 0x127   : > { %672 = dma.done.wait (%p846_p7), [#allocation4], 64  }
 0x128   : > { %674 = vsyncadd (%p846_p7), [#allocation4], 4294967232 }
 0x129 PF: > { %s19_s14 = sadd.s32 1, %s697_s14   ;;  %s887_s9 = smov %s681_s10 }
 0x12a   : > { %p16_p0 = scmp.ge.s32.totalorder %s19_s14, 4   ;;  %s888_s10 = smov %s685_s11 }
 0x12b   : > { %s889_s11 = smov %s770_s21  ;;  %s890_s12 = smov %s693_s13 }
 0x12c   : > { %s891_s13 = smov %s893_s16  ;;  %18 = sbr.rel (!%p16_p0) target bundleno = 7 (0x7), region = 83 }
 0x131   :  { %381 = vsyncpa [#allocation3], 1 }
 0x132   :  { %383 = vsyncpa [#allocation3 + $0x1], 1 }
 0x133   :  { %384 = vsyncpa [#allocation6], 1 }
 0x134   :  { %386 = vsyncpa [#allocation6 + $0x1], 1 }
 0x135   :  { %387 = vsyncpa [#allocation4], 1 }
 0x136   :  { %389 = vsyncpa [#allocation4 + $0x1], 1 }

</bundles_post_ra>
